<compile_context>
chip_gen: v5e
topology: v5e:2x2
jax: 0.10.0
libtpu: 0.0.40
codegen_flags: <defaults>
</compile_context>

<pallas_src>
import jax
import jax.numpy as jnp
from jax.experimental import pallas as pl
from jax.experimental.pallas import tpu as pltpu

EPS = 1e-08


def _signed_error_kernel(packed_ref, area_ref, out_ref):
    # packed_ref : VMEM ref of shape (K, 5) = [tgt_x, tgt_y, tgt_v, inp_x, inp_y]
    # area_ref   : SMEM ref of shape (1,)
    # out_ref    : SMEM ref of shape (1,)
    packed = packed_ref[...]                      # (K, 5) — one vreg-sized tile
    tgt_xy = packed[:, 0:2]                       # (K, 2)
    v = packed[:, 2:3]                            # (K, 1) visibility, broadcasts over x/y
    inp_xy = packed[:, 3:5]                       # (K, 2)

    # Elementwise hot path: no per-element division (area is constant over the block).
    s = jnp.sum((tgt_xy - inp_xy) * v)            # scalar, XLU reduction

    area = area_ref[0]
    denom = (area + EPS) * (jnp.sum(v) + EPS)     # scalar
    out_ref[0] = s / denom                        # single exact scalar divide


def keypoint_signed_error(input_poses, target_poses, areas):
    """input_poses, target_poses: (K, 3); areas: scalar. Returns scalar f32."""
    inp = jnp.asarray(input_poses, jnp.float32)
    tgt = jnp.asarray(target_poses, jnp.float32)
    area = jnp.asarray(areas, jnp.float32).reshape((1,))

    # Pack target (x, y, v) and input (x, y) into one operand -> single input DMA,
    # input visibility column (dead data) dropped.
    packed = jnp.concatenate([tgt, inp[:, 0:2]], axis=1)     # (K, 5)

    out = pl.pallas_call(
        _signed_error_kernel,
        out_shape=jax.ShapeDtypeStruct((1,), jnp.float32),
        in_specs=[
            pl.BlockSpec(memory_space=pltpu.MemorySpace.VMEM),
            pl.BlockSpec(memory_space=pltpu.MemorySpace.SMEM),
        ],
        out_specs=pl.BlockSpec(memory_space=pltpu.MemorySpace.SMEM),
    )(packed, area)
    return out[0]


def _reference(input_poses, target_poses, areas):
    # Plain-JAX reference mirroring the PyTorch forward exactly.
    target_v = target_poses[:, 2][:, None]
    se = (target_poses[:, 0:2] - input_poses[:, 0:2]) * target_v / (areas + EPS)
    return se.sum() / (target_v.sum() + EPS)


if __name__ == "__main__":
    K = 8  # number of keypoints
    key = jax.random.PRNGKey(0)
    k1, k2, k3 = jax.random.split(key, 3)

    # Deterministic synthetic inputs: (K, 3) poses with x, y coords and 0/1 visibility.
    input_xy = jax.random.uniform(k1, (K, 2), dtype=jnp.float32) * 16.0
    target_xy = jax.random.uniform(k2, (K, 2), dtype=jnp.float32) * 16.0
    vis = (jax.random.uniform(k3, (K, 1), dtype=jnp.float32) > 0.3).astype(jnp.float32)

    input_poses = jnp.concatenate([input_xy, vis], axis=-1)    # (K, 3)
    target_poses = jnp.concatenate([target_xy, vis], axis=-1)  # (K, 3)
    areas = jnp.float32(64.0)

    result = keypoint_signed_error(input_poses, target_poses, areas)
    result = jax.block_until_ready(result)

    ref = _reference(input_poses, target_poses, areas)
    assert jnp.allclose(result, ref, rtol=1e-5, atol=1e-6), (result, ref)

    print("KERNEL_OK")
</pallas_src>

<mosaic_0001>
module attributes {stable_mosaic.version = 11 : i64} {
  func.func @_signed_error_kernel(%arg0: memref<8x5xf32, #tpu.memory_space<vmem>>, %arg1: memref<1xf32, #tpu.memory_space<smem>>, %arg2: memref<1xf32, #tpu.memory_space<smem>>) attributes {dimension_semantics = [], scalar_prefetch = 0 : i64, scratch_operands = 0 : i64, tpu.core_type = #tpu.core_type<tc>} {
    %c0 = arith.constant 0 : index
    %c0_0 = arith.constant 0 : index
    %0 = vector.load %arg0[%c0, %c0_0] : memref<8x5xf32, #tpu.memory_space<vmem>>, vector<8x5xf32>
    %1 = vector.extract_strided_slice %0 {offsets = [0, 0], sizes = [8, 2], strides = [1, 1]} : vector<8x5xf32> to vector<8x2xf32>
    %2 = vector.extract_strided_slice %0 {offsets = [0, 2], sizes = [8, 1], strides = [1, 1]} : vector<8x5xf32> to vector<8x1xf32>
    %3 = vector.extract_strided_slice %0 {offsets = [0, 3], sizes = [8, 2], strides = [1, 1]} : vector<8x5xf32> to vector<8x2xf32>
    %4 = arith.subf %1, %3 : vector<8x2xf32>
    %5 = vector.broadcast %2 : vector<8x1xf32> to vector<8x2xf32>
    %6 = arith.mulf %4, %5 : vector<8x2xf32>
    %7 = vector.shape_cast %6 : vector<8x2xf32> to vector<1x8x2xf32>
    %cst = arith.constant dense<0.000000e+00> : vector<1xf32>
    %8 = vector.multi_reduction <add>, %7, %cst [1, 2] : vector<1x8x2xf32> to vector<1xf32>
    %9 = vector.shape_cast %8 : vector<1xf32> to vector<1x1x1xf32>
    %10 = vector.extract %9[0, 0, 0] : f32 from vector<1x1x1xf32>
    %c0_1 = arith.constant 0 : index
    %11 = memref.load %arg1[%c0_1] : memref<1xf32, #tpu.memory_space<smem>>
    %cst_2 = arith.constant 9.99999993E-9 : f32
    %12 = arith.addf %11, %cst_2 : f32
    %13 = vector.shape_cast %2 : vector<8x1xf32> to vector<1x8x1xf32>
    %cst_3 = arith.constant dense<0.000000e+00> : vector<1xf32>
    %14 = vector.multi_reduction <add>, %13, %cst_3 [1, 2] : vector<1x8x1xf32> to vector<1xf32>
    %15 = vector.shape_cast %14 : vector<1xf32> to vector<1x1x1xf32>
    %16 = vector.extract %15[0, 0, 0] : f32 from vector<1x1x1xf32>
    %cst_4 = arith.constant 9.99999993E-9 : f32
    %17 = arith.addf %16, %cst_4 : f32
    %18 = arith.mulf %12, %17 : f32
    %19 = arith.divf %10, %18 : f32
    %c0_5 = arith.constant 0 : index
    %20 = memref.load %arg2[%c0_5] : memref<1xf32, #tpu.memory_space<smem>>
    memref.store %19, %arg2[%c0_5] : memref<1xf32, #tpu.memory_space<smem>>
    return
  }
}

</mosaic_0001>

<bundles_post_ra>
// kernel: tpu_custom_call.1
= control target key start
LH: loop header
LB: loop body
LE: loop exit
PB: predicated region body
PF: predicated region fallthrough
CT: control target
= control target key end

     0   :  { %8 = vsyncpa [#allocation4], 0  ;;  %s185_s0 = inlined_call_operand.hbm [shape: f32[8,5], index: 0, kind: input, shape index: {}]   ;;  %s186_s1 = inlined_call_operand.<no memory space> [shape: f32[1], index: 1, kind: input, shape index: {}]   ;;  %s187_s2 = inlined_call_operand.hbm [shape: f32[1], index: 2, kind: output, shape index: {}]  }
   0x1   :  { %9 = vsyncpa [#allocation5], 0  ;;  %s15_s11 = sshll.u32 %s185_s0, 4  ;;  %s156_s12 = smov [#allocation3]   ;;  %s16_s11 = int_to_ptr.hbm [resolvable:$true] %s15_s11 }
   0x2   :  { %s17_s13 = sshll.u32 %s156_s12, 4  ;;  %s18_s13 = int_to_ptr.vmem [resolvable:$true] %s17_s13 }
   0x3   :  { %20 = dma.hbm_to_vmem [thread:$0]  %s16_s11, 128, %s18_s13, [#allocation4]  }
   0x4   :  { %152 = dma.done.wait [#allocation4], 128  }
   0x5   :  { %153 = vsyncadd [#allocation4], 4294967168  ;;  %v157_v0 = vmov 2   ;;  %v27_v1 = vld [vmem:[#allocation3] sm:$0xff]  ;;  %s158_s14 = smov 125   ;;  %s159_s15 = smov 126  }
   0x6   :  { %113 = vset.pattern.permute.xlu0 %v157_v0  ;;  %51 = vrot.lane.b32.xlu1 %v27_v1, %s159_s15  ;;  %vm54_vm0 = vcmask 7168   ;;  %vm38_vm1 = vcmask 15360   ;;  %s50_s18 = sadd.f32 1e-08, %s186_s1  ;;  %s91_s23 = sshll.u32 %s187_s2, 4  ;;  %s92_s23 = int_to_ptr.hbm [resolvable:$true] %s91_s23 }
   0x7   :  { %29 = vrot.lane.b32.xlu0 %v27_v1, %s158_s14  ;;  %s160_s26 = smov [#allocation6]  }
   0xf   :  { %34 = vperm.xlu0 %113, %v27_v1  }
  0x78   :  { %v52_v3 = vpop.permute.xlu1 %51 }
  0x79   :  { %v30_v2 = vpop.permute.xlu0 %29  ;;  %v55_v4 = vsel %vm54_vm0, %v52_v3, 0.0 }
  0x7a   :  { %56 = vadd.xlane.f32.xlu2 %v55_v4  ;;  %v32_v5 = vsub.f32 %v27_v1, %v30_v2 }
  0x81   :  { %v35_v6 = vpop.permute.xlu0 %34 }
  0x82   :  { %v37_v7 = vmul.f32 %v35_v6, %v32_v5 }
  0x84   :  { %v39_v8 = vsel %vm38_vm1, %v37_v7, 0.0 }
  0x85   :  { %40 = vadd.xlane.f32.xlu1 %v39_v8 }
  0xed   :  { %v57_v9 = vpop.xlane.xlu2 %56 }
  0xee   :  { %v58_v10 = vrot.slane %v57_v9, 4 }
  0xf0   :  { %v59_v11 = vadd.f32 %v58_v10, %v57_v9 }
  0xf2   :  { %v60_v12 = vrot.slane %v59_v11, 2 }
  0xf4   :  { %v61_v16 = vadd.f32 %v60_v12, %v59_v11 }
  0xf6   :  { %v62_v19 = vrot.slane %v61_v16, 1 }
  0xf8   :  { %v41_v13 = vpop.xlane.xlu1 %40  ;;  %v63_v22 = vadd.f32 %v62_v19, %v61_v16 }
  0xf9   :  { %v42_v14 = vrot.slane %v41_v13, 4 }
  0xfb   :  { %v43_v15 = vadd.f32 %v42_v14, %v41_v13 }
  0xfd   :  { %v44_v17 = vrot.slane %v43_v15, 2 }
  0xff   :  { %v45_v18 = vadd.f32 %v44_v17, %v43_v15 }
 0x101   :  { %v46_v20 = vrot.slane %v45_v18, 1 }
 0x103   :  { %v47_v21 = vadd.f32 %v46_v20, %v45_v18 }
 0x105   :  { %102 = vpush %v47_v21 }
 0x106   :  { %104 = vpush %v63_v22 }
 0x136   :  { %s103_s0 = spop %102 }
 0x137   :  { %s105_s19 = spop %104 }
 0x138   :  { %s65_s20 = sadd.f32 1e-08, %s105_s19 }
 0x13a   :  { %s66_s21 = smul.f32 %s65_s20, %s50_s18 }
 0x13c   :  { %v67_v23 = vstv %s66_s21 }
 0x13d   :  { %114 = vrcp.f32 %v67_v23  ;;  %v79_v27 = vand.u32 2147483648, %v67_v23  ;;  %v77_v29 = vand.u32 2147483647, %v67_v23  ;;  %vm73_vm3 = vweird.f32 %v67_v23 }
 0x13f   :  { %v80_v31 = vor.u32 1.1754944e-38, %v79_v27  ;;  %vm78_vm5 = vcmp.eq.f32.partialorder %v77_v29, 8.507059e+37 }
 0x143   :  { %v115_v24 = vpop.eup %114 }
 0x144   :  { %v69_v25 = vmul.f32 %v115_v24, %v67_v23  ;;  %vm74_vm2 = vweird.f32 %v115_v24 }
 0x145   :  { %vm75_vm4 = vmor %vm73_vm3, %vm74_vm2 }
 0x146   :  { %v70_v26 = vsub.f32 1.0, %v69_v25 }
 0x148   :  { %v71_v28 = vmul.f32 %v115_v24, %v70_v26 }
 0x14a   :  { %v72_v30 = vadd.f32 %v115_v24, %v71_v28 }
 0x14c   :  { %v76_v32 = vsel %vm75_vm4, %v115_v24, %v72_v30 }
 0x14d   :  { %v81_v33 = vsel %vm78_vm5, %v80_v31, %v76_v32 }
 0x14e   :  { %106 = vpush %v81_v33 }
 0x17f   :  { %s107_s24 = spop %106 }
 0x180   :  { %s83_s25 = smul.f32 %s107_s24, %s103_s0 }
 0x182   :  { %85 = sst [smem:[#allocation6]] %s83_s25 }
 0x183   :  { %94 = dma.smem_to_hbm %s160_s26, 16, %s92_s23, [#allocation5]  }
 0x184   :  { %154 = dma.done.wait [#allocation5], 16  }
 0x185   :  { %155 = vsyncadd [#allocation5], 4294967280 }
 0x186   :  { %99 = sfence }
 0x187   :  { %100 = vsyncpa [#allocation4], 1 }
 0x188   :  { %101 = vsyncpa [#allocation5], 1 }

</bundles_post_ra>
